<compile_context>
chip_gen: v7x
topology: tpu7x:2x2x1
jax: 0.10.0
libtpu: 0.0.40
codegen_flags: <defaults>
</compile_context>

<pallas_src>
import functools
import math

import jax
import jax.numpy as jnp
from jax import lax
from jax.experimental import pallas as pl
from jax.experimental.pallas import tpu as pltpu

_VMEM_LIMIT = 32 * 1024 * 1024  # bytes


# ----------------------------------------------------------------------------
# helpers
# ----------------------------------------------------------------------------

def _pick_tile(dim, candidates):
    """Largest candidate dividing `dim`, preferring >= 2 grid steps."""
    for c in candidates:
        if dim % c == 0 and dim // c >= 2:
            return c
    for c in candidates:
        if dim % c == 0:
            return c
    return dim


_TOK_TILES = (256, 128, 64, 32, 16, 8)
_OUT_TILES = (512, 256, 128)


def _gelu(x):
    # TODO(synk): torch nn.GELU default is exact erf-GELU; tanh approximation
    # is used for guaranteed Mosaic lowering (difference ~1e-3).
    return jax.nn.gelu(x, approximate=True)


def _layernorm_f32(x, g, b, eps):
    mu = jnp.mean(x, axis=-1, keepdims=True)
    xc = x - mu
    var = jnp.mean(xc * xc, axis=-1, keepdims=True)
    return xc * lax.rsqrt(var + eps) * g + b


def _bf16(x):
    return x.astype(jnp.bfloat16)


# ----------------------------------------------------------------------------
# Pallas kernels
# ----------------------------------------------------------------------------

def _ln_qkv_kernel(*refs, eps, has_pos):
    """LN(x) (+pos for Q/K) -> Q, K (concat weight) and V projections."""
    if has_pos:
        (x_ref, pos_ref, g_ref, b_ref, wqk_ref, bqk_ref, wv_ref, bv_ref,
         q_ref, k_ref, v_ref) = refs
    else:
        (x_ref, g_ref, b_ref, wqk_ref, bqk_ref, wv_ref, bv_ref,
         q_ref, k_ref, v_ref) = refs
        pos_ref = None
    x = x_ref[...].astype(jnp.float32)
    xn = _layernorm_f32(x, g_ref[...].astype(jnp.float32),
                        b_ref[...].astype(jnp.float32), eps)
    qk_in = xn if pos_ref is None else xn + pos_ref[...].astype(jnp.float32)
    qk = jnp.dot(_bf16(qk_in), wqk_ref[...],
                 preferred_element_type=jnp.float32)
    qk = qk + bqk_ref[...].astype(jnp.float32)
    v = jnp.dot(_bf16(xn), wv_ref[...], preferred_element_type=jnp.float32)
    v = v + bv_ref[...].astype(jnp.float32)
    dm = q_ref.shape[-1]
    q_ref[...] = qk[:, :dm].astype(q_ref.dtype)
    k_ref[...] = qk[:, dm:].astype(k_ref.dtype)
    v_ref[...] = v.astype(v_ref.dtype)


def _kv_proj_kernel(*refs, has_pos):
    """Cross-attention memory projections: K = (mem + pos) Wk, V = mem Wv."""
    if has_pos:
        mem_ref, pos_ref, wk_ref, bk_ref, wv_ref, bv_ref, k_ref, v_ref = refs
    else:
        mem_ref, wk_ref, bk_ref, wv_ref, bv_ref, k_ref, v_ref = refs
        pos_ref = None
    mem = mem_ref[...].astype(jnp.float32)
    k_in = mem if pos_ref is None else mem + pos_ref[...].astype(jnp.float32)
    k = jnp.dot(_bf16(k_in), wk_ref[...], preferred_element_type=jnp.float32)
    k = k + bk_ref[...].astype(jnp.float32)
    v = jnp.dot(_bf16(mem), wv_ref[...], preferred_element_type=jnp.float32)
    v = v + bv_ref[...].astype(jnp.float32)
    k_ref[...] = k.astype(k_ref.dtype)
    v_ref[...] = v.astype(v_ref.dtype)


def _ln_linear_kernel(*refs, eps, has_pos, activation):
    """LN(x) (+pos) @ W + b (+GELU)."""
    if has_pos:
        x_ref, pos_ref, g_ref, b_ref, w_ref, bias_ref, o_ref = refs
    else:
        x_ref, g_ref, b_ref, w_ref, bias_ref, o_ref = refs
        pos_ref = None
    x = x_ref[...].astype(jnp.float32)
    xn = _layernorm_f32(x, g_ref[...].astype(jnp.float32),
                        b_ref[...].astype(jnp.float32), eps)
    if pos_ref is not None:
        xn = xn + pos_ref[...].astype(jnp.float32)
    acc = jnp.dot(_bf16(xn), w_ref[...], preferred_element_type=jnp.float32)
    acc = acc + bias_ref[...].astype(jnp.float32)
    if activation == "gelu":
        acc = _gelu(acc)
    o_ref[...] = acc.astype(o_ref.dtype)


def _linear_kernel(*refs, activation, has_residual):
    """x @ W + b (+GELU) (+fused residual add)."""
    if has_residual:
        x_ref, w_ref, bias_ref, r_ref, o_ref = refs
    else:
        x_ref, w_ref, bias_ref, o_ref = refs
        r_ref = None
    acc = jnp.dot(_bf16(x_ref[...]), w_ref[...],
                  preferred_element_type=jnp.float32)
    acc = acc + bias_ref[...].astype(jnp.float32)
    if activation == "gelu":
        acc = _gelu(acc)
    if r_ref is not None:
        acc = acc + r_ref[...].astype(jnp.float32)
    o_ref[...] = acc.astype(o_ref.dtype)


def _sdpa_kernel(q_ref, k_ref, v_ref, o_ref, *, n_heads, scale):
    """Multi-head attention for one query tile, all batches & heads.

    q block: [tq, B, D]; k/v blocks: [S, B, D] (full); out: [tq, B, D].
    D = n_heads * head_dim.  Per-(batch, head) 2D matmuls are unrolled at
    trace time (B and H are small compile-time constants).
    """
    tq, bsz, dm = q_ref.shape
    dh = dm // n_heads
    q_all = q_ref[...].astype(jnp.float32) * scale
    k_all = k_ref[...].astype(jnp.float32)
    v_all = v_ref[...].astype(jnp.float32)
    for b in range(bsz):
        q_b = _bf16(q_all[:, b, :])          # [tq, D]
        k_b = _bf16(k_all[:, b, :])          # [S,  D]
        v_b = _bf16(v_all[:, b, :])          # [S,  D]
        head_outs = []
        for h in range(n_heads):
            lo = h * dh
            s = lax.dot_general(
                q_b[:, lo:lo + dh], k_b[:, lo:lo + dh],
                (((1,), (1,)), ((), ())),
                preferred_element_type=jnp.float32)          # [tq, S]
            m = jnp.max(s, axis=-1, keepdims=True)
            p = jnp.exp(s - m)
            l = jnp.sum(p, axis=-1, keepdims=True)
            o = jnp.dot(_bf16(p), v_b[:, lo:lo + dh],
                        preferred_element_type=jnp.float32)  # [tq, dh]
            head_outs.append(o * pl.reciprocal(l, approx=True))
        o_ref[:, b, :] = jnp.concatenate(head_outs, axis=-1).astype(o_ref.dtype)


# ----------------------------------------------------------------------------
# pallas_call wrappers
# ----------------------------------------------------------------------------

def ln_qkv_pallas(x, pos, gamma, beta, wqk, bqk, wv, bv, *, eps=1e-5):
    m, d = x.shape
    tm = _pick_tile(m, _TOK_TILES)
    has_pos = pos is not None
    x_spec = pl.BlockSpec((tm, d), lambda i: (i, 0))
    vec_d = pl.BlockSpec((1, d), lambda i: (0, 0))
    vec_2d = pl.BlockSpec((1, 2 * d), lambda i: (0, 0))
    in_specs = [x_spec]
    args = [x]
    if has_pos:
        in_specs.append(x_spec)
        args.append(pos)
    in_specs += [vec_d, vec_d,
                 pl.BlockSpec((d, 2 * d), lambda i: (0, 0)), vec_2d,
                 pl.BlockSpec((d, d), lambda i: (0, 0)), vec_d]
    args += [gamma.reshape(1, d), beta.reshape(1, d),
             wqk, bqk.reshape(1, 2 * d), wv, bv.reshape(1, d)]
    out_spec = pl.BlockSpec((tm, d), lambda i: (i, 0))
    q, k, v = pl.pallas_call(
        functools.partial(_ln_qkv_kernel, eps=eps, has_pos=has_pos),
        grid=(m // tm,),
        in_specs=in_specs,
        out_specs=[out_spec, out_spec, out_spec],
        out_shape=[jax.ShapeDtypeStruct((m, d), x.dtype)] * 3,
        compiler_params=pltpu.CompilerParams(
            dimension_semantics=("parallel",),
            vmem_limit_bytes=_VMEM_LIMIT),
    )(*args)
    return q, k, v


def kv_proj_pallas(mem, pos, wk, bk, wv, bv):
    m, d = mem.shape
    tm = _pick_tile(m, _TOK_TILES)
    has_pos = pos is not None
    x_spec = pl.BlockSpec((tm, d), lambda i: (i, 0))
    vec_d = pl.BlockSpec((1, d), lambda i: (0, 0))
    w_spec = pl.BlockSpec((d, d), lambda i: (0, 0))
    in_specs = [x_spec]
    args = [mem]
    if has_pos:
        in_specs.append(x_spec)
        args.append(pos)
    in_specs += [w_spec, vec_d, w_spec, vec_d]
    args += [wk, bk.reshape(1, d), wv, bv.reshape(1, d)]
    out_spec = pl.BlockSpec((tm, d), lambda i: (i, 0))
    k, v = pl.pallas_call(
        functools.partial(_kv_proj_kernel, has_pos=has_pos),
        grid=(m // tm,),
        in_specs=in_specs,
        out_specs=[out_spec, out_spec],
        out_shape=[jax.ShapeDtypeStruct((m, d), mem.dtype)] * 2,
        compiler_params=pltpu.CompilerParams(
            dimension_semantics=("parallel",),
            vmem_limit_bytes=_VMEM_LIMIT),
    )(*args)
    return k, v


def ln_linear_pallas(x, pos, gamma, beta, w, b, *, activation=None, eps=1e-5):
    m, d = x.shape
    n = w.shape[1]
    tm = _pick_tile(m, _TOK_TILES)
    tn = _pick_tile(n, _OUT_TILES)
    has_pos = pos is not None
    x_spec = pl.BlockSpec((tm, d), lambda i, j: (i, 0))
    in_specs = [x_spec]
    args = [x]
    if has_pos:
        in_specs.append(x_spec)
        args.append(pos)
    in_specs += [
        pl.BlockSpec((1, d), lambda i, j: (0, 0)),
        pl.BlockSpec((1, d), lambda i, j: (0, 0)),
        pl.BlockSpec((d, tn), lambda i, j: (0, j)),
        pl.BlockSpec((1, tn), lambda i, j: (0, j)),
    ]
    args += [gamma.reshape(1, d), beta.reshape(1, d), w, b.reshape(1, n)]
    return pl.pallas_call(
        functools.partial(_ln_linear_kernel, eps=eps, has_pos=has_pos,
                          activation=activation),
        grid=(m // tm, n // tn),
        in_specs=in_specs,
        out_specs=pl.BlockSpec((tm, tn), lambda i, j: (i, j)),
        out_shape=jax.ShapeDtypeStruct((m, n), x.dtype),
        compiler_params=pltpu.CompilerParams(
            dimension_semantics=("parallel", "parallel"),
            vmem_limit_bytes=_VMEM_LIMIT),
    )(*args)


def linear_pallas(x, w, b, *, activation=None, residual=None):
    m, k = x.shape
    k2, n = w.shape
    assert k == k2
    tm = _pick_tile(m, _TOK_TILES)
    tn = _pick_tile(n, _OUT_TILES)
    has_res = residual is not None
    in_specs = [
        pl.BlockSpec((tm, k), lambda i, j: (i, 0)),
        pl.BlockSpec((k, tn), lambda i, j: (0, j)),
        pl.BlockSpec((1, tn), lambda i, j: (0, j)),
    ]
    args = [x, w, b.reshape(1, n)]
    if has_res:
        in_specs.append(pl.BlockSpec((tm, tn), lambda i, j: (i, j)))
        args.append(residual)
    return pl.pallas_call(
        functools.partial(_linear_kernel, activation=activation,
                          has_residual=has_res),
        grid=(m // tm, n // tn),
        in_specs=in_specs,
        out_specs=pl.BlockSpec((tm, tn), lambda i, j: (i, j)),
        out_shape=jax.ShapeDtypeStruct((m, n), x.dtype),
        compiler_params=pltpu.CompilerParams(
            dimension_semantics=("parallel", "parallel"),
            vmem_limit_bytes=_VMEM_LIMIT),
    )(*args)


def sdpa_pallas(q, k, v, *, n_heads, scale):
    """q: [T, B, D]; k/v: [S, B, D]; returns [T, B, D] (torch MHA semantics)."""
    t, bsz, d = q.shape
    s_len = k.shape[0]
    tq = _pick_tile(t, _TOK_TILES)
    return pl.pallas_call(
        functools.partial(_sdpa_kernel, n_heads=n_heads, scale=scale),
        grid=(t // tq,),
        in_specs=[
            pl.BlockSpec((tq, bsz, d), lambda i: (i, 0, 0)),
            pl.BlockSpec((s_len, bsz, d), lambda i: (0, 0, 0)),
            pl.BlockSpec((s_len, bsz, d), lambda i: (0, 0, 0)),
        ],
        out_specs=pl.BlockSpec((tq, bsz, d), lambda i: (i, 0, 0)),
        out_shape=jax.ShapeDtypeStruct((t, bsz, d), q.dtype),
        compiler_params=pltpu.CompilerParams(
            dimension_semantics=("parallel",),
            vmem_limit_bytes=_VMEM_LIMIT),
    )(q, k, v)


# ----------------------------------------------------------------------------
# TransformerDecoderLayer forward (eval mode; dropout == identity)
# ----------------------------------------------------------------------------

def transformer_decoder_layer_pallas(trg, memory, params, *, n_heads,
                                     trg_pos=None, src_pos=None,
                                     trg_mask=None, memory_mask=None,
                                     eps=1e-5):
    # TODO(synk): attn_mask / key_padding_mask support.
    assert trg_mask is None and memory_mask is None
    t, b, d = trg.shape
    s = memory.shape[0]
    dh = d // n_heads
    scale = 1.0 / math.sqrt(dh)

    trg2 = trg.reshape(t * b, d)
    mem2 = memory.reshape(s * b, d)
    trg_pos2 = None if trg_pos is None else trg_pos.reshape(t * b, d)
    src_pos2 = None if src_pos is None else src_pos.reshape(s * b, d)

    # ---- self attention: fused LN + pos + QKV projection (shared self.norm)
    p = params["slf"]
    q, k, v = ln_qkv_pallas(trg2, trg_pos2, params["norm_g"], params["norm_b"],
                            p["wqk"], p["bqk"], p["wv"], p["bv"], eps=eps)
    attn = sdpa_pallas(q.reshape(t, b, d), k.reshape(t, b, d),
                       v.reshape(t, b, d), n_heads=n_heads, scale=scale)
    out = linear_pallas(attn.reshape(t * b, d), p["wo"], p["bo"],
                        residual=trg2)

    # ---- cross attention: fused LN + pos + Q; fused pos + K/V on memory ----
    p = params["crs"]
    qx = ln_linear_pallas(out, trg_pos2, params["norm_g"], params["norm_b"],
                          p["wq"], p["bq"], eps=eps)
    kx, vx = kv_proj_pallas(mem2, src_pos2, p["wk"], p["bk"], p["wv"], p["bv"])
    attn = sdpa_pallas(qx.reshape(t, b, d), kx.reshape(s, b, d),
                       vx.reshape(s, b, d), n_heads=n_heads, scale=scale)
    out = linear_pallas(attn.reshape(t * b, d), p["wo"], p["bo"], residual=out)

    # ---- position-wise FFN: fused LN + W1 + GELU; W2 + residual ----
    hid = ln_linear_pallas(out, None, params["ffn_norm_g"], params["ffn_norm_b"],
                           params["ffn_w1"], params["ffn_b1"],
                           activation="gelu", eps=eps)
    out = linear_pallas(hid, params["ffn_w2"], params["ffn_b2"], residual=out)

    return out.reshape(t, b, d), None, None


# ----------------------------------------------------------------------------
# Synthetic parameters (weights already [in, out] and bf16 for the MXU)
# ----------------------------------------------------------------------------

def make_params(key, d_model, d_ffn):
    keys = iter(jax.random.split(key, 24))

    def lin_w(fan_in, fan_out):
        w = (1.0 / fan_in) ** 0.5 * jax.random.normal(
            next(keys), (fan_in, fan_out), jnp.float32)
        return w.astype(jnp.bfloat16)

    def lin_b(fan_out):
        return 0.02 * jax.random.normal(next(keys), (fan_out,), jnp.float32)

    def norm_w(d):
        return 1.0 + 0.1 * jax.random.normal(next(keys), (d,), jnp.float32)

    def norm_b(d):
        return 0.05 * jax.random.normal(next(keys), (d,), jnp.float32)

    def attn_params():
        wq, bq = lin_w(d_model, d_model), lin_b(d_model)
        wk, bk = lin_w(d_model, d_model), lin_b(d_model)
        wv, bv = lin_w(d_model, d_model), lin_b(d_model)
        wo, bo = lin_w(d_model, d_model), lin_b(d_model)
        return dict(wq=wq, bq=bq, wk=wk, bk=bk, wv=wv, bv=bv, wo=wo, bo=bo,
                    wqk=jnp.concatenate([wq, wk], axis=1),
                    bqk=jnp.concatenate([bq, bk], axis=0))

    return dict(
        norm_g=norm_w(d_model), norm_b=norm_b(d_model),
        ffn_norm_g=norm_w(d_model), ffn_norm_b=norm_b(d_model),
        slf=attn_params(),
        crs=attn_params(),
        ffn_w1=lin_w(d_model, d_ffn), ffn_b1=lin_b(d_ffn),
        ffn_w2=lin_w(d_ffn, d_model), ffn_b2=lin_b(d_model),
    )


# ----------------------------------------------------------------------------
# Pure-JAX reference mirroring the torch forward (and the kernels' bf16 dots)
# ----------------------------------------------------------------------------

def _ref_dot(x, w):
    return jnp.dot(x.astype(jnp.bfloat16), w.astype(jnp.bfloat16),
                   preferred_element_type=jnp.float32)


def _ref_layernorm(x, g, b, eps=1e-5):
    mu = jnp.mean(x, -1, keepdims=True)
    xc = x - mu
    var = jnp.mean(xc * xc, -1, keepdims=True)
    return xc * lax.rsqrt(var + eps) * g + b


def _ref_mha(q_in, k_in, v_in, p, n_heads):
    lq, b, d = q_in.shape
    lk = k_in.shape[0]
    h = n_heads
    dh = d // h
    scale = 1.0 / math.sqrt(dh)
    qp = _ref_dot(q_in.reshape(-1, d), p["wq"]) + p["bq"]
    kp = _ref_dot(k_in.reshape(-1, d), p["wk"]) + p["bk"]
    vp = _ref_dot(v_in.reshape(-1, d), p["wv"]) + p["bv"]
    qh = qp.reshape(lq, b * h, dh).transpose(1, 0, 2)
    kh = kp.reshape(lk, b * h, dh).transpose(1, 0, 2)
    vh = vp.reshape(lk, b * h, dh).transpose(1, 0, 2)
    s = jnp.einsum("bld,bsd->bls", (qh * scale).astype(jnp.bfloat16),
                   kh.astype(jnp.bfloat16),
                   preferred_element_type=jnp.float32)
    m = jnp.max(s, axis=-1, keepdims=True)
    pexp = jnp.exp(s - m)
    l = jnp.sum(pexp, axis=-1, keepdims=True)
    oh = jnp.einsum("bls,bsd->bld", pexp.astype(jnp.bfloat16),
                    vh.astype(jnp.bfloat16),
                    preferred_element_type=jnp.float32) / l
    o = oh.transpose(1, 0, 2).reshape(lq * b, d)
    return _ref_dot(o, p["wo"]) + p["bo"]


def transformer_decoder_layer_ref(trg, memory, params, *, n_heads,
                                  trg_pos=None, src_pos=None, eps=1e-5):
    t, b, d = trg.shape
    x = trg.reshape(-1, d)
    res = x
    xn = _ref_layernorm(x, params["norm_g"], params["norm_b"], eps).reshape(t, b, d)
    qk = xn if trg_pos is None else xn + trg_pos
    out = _ref_mha(qk, qk, xn, params["slf"], n_heads) + res

    res = out
    on = _ref_layernorm(out, params["norm_g"], params["norm_b"], eps).reshape(t, b, d)
    qi = on if trg_pos is None else on + trg_pos
    ki = memory if src_pos is None else memory + src_pos
    out = _ref_mha(qi, ki, memory, params["crs"], n_heads) + res

    res = out
    fn = _ref_layernorm(out, params["ffn_norm_g"], params["ffn_norm_b"], eps)
    hid = _gelu(_ref_dot(fn, params["ffn_w1"]) + params["ffn_b1"])
    out = _ref_dot(hid, params["ffn_w2"]) + params["ffn_b2"] + res
    return out.reshape(t, b, d)


# ----------------------------------------------------------------------------

if __name__ == "__main__":
    key = jax.random.PRNGKey(0)
    k_par, k_trg, k_mem, k_tp, k_sp = jax.random.split(key, 5)

    # small shapes consistent with the module (seq-first layout like torch MHA)
    T, S, B = 16, 32, 2          # target length, memory length, batch
    D, H, D_FFN = 128, 4, 256    # d_model, n_heads, d_ffn

    params = make_params(k_par, D, D_FFN)
    trg = jax.random.normal(k_trg, (T, B, D), jnp.float32)
    memory = jax.random.normal(k_mem, (S, B, D), jnp.float32)
    trg_pos = 0.1 * jax.random.normal(k_tp, (T, B, D), jnp.float32)
    src_pos = 0.1 * jax.random.normal(k_sp, (S, B, D), jnp.float32)

    out, _, _ = transformer_decoder_layer_pallas(
        trg, memory, params, n_heads=H, trg_pos=trg_pos, src_pos=src_pos)
    out = jax.block_until_ready(out)

    out_ref = transformer_decoder_layer_ref(
        trg, memory, params, n_heads=H, trg_pos=trg_pos, src_pos=src_pos)

    assert out.shape == (T, B, D)
    max_err = float(jnp.max(jnp.abs(out - out_ref)))
    assert jnp.allclose(out, out_ref, atol=2e-2, rtol=2e-2), (
        f"output mismatch, max abs err = {max_err}")

    print("KERNEL_OK")
</pallas_src>

<mosaic_0001>
module attributes {stable_mosaic.version = 11 : i64} {
  func.func @_ln_qkv_kernel(%arg0: i32, %arg1: memref<16x128xf32, #tpu.memory_space<vmem>>, %arg2: memref<16x128xf32, #tpu.memory_space<vmem>>, %arg3: memref<1x128xf32, #tpu.memory_space<vmem>>, %arg4: memref<1x128xf32, #tpu.memory_space<vmem>>, %arg5: memref<128x256xbf16, #tpu.memory_space<vmem>>, %arg6: memref<1x256xf32, #tpu.memory_space<vmem>>, %arg7: memref<128x128xbf16, #tpu.memory_space<vmem>>, %arg8: memref<1x128xf32, #tpu.memory_space<vmem>>, %arg9: memref<16x128xf32, #tpu.memory_space<vmem>>, %arg10: memref<16x128xf32, #tpu.memory_space<vmem>>, %arg11: memref<16x128xf32, #tpu.memory_space<vmem>>) attributes {dimension_semantics = [#tpu.dimension_semantics<parallel>], iteration_bounds = array<i64: 2>, scalar_prefetch = 0 : i64, scratch_operands = 0 : i64, tpu.core_type = #tpu.core_type<tc>, window_params = [{transform_indices = @transform_0, window_bounds = array<i64: 16, 128>}, {transform_indices = @transform_1, window_bounds = array<i64: 16, 128>}, {pipeline_mode = #tpu.pipeline_mode<synchronous>, transform_indices = @transform_2, window_bounds = array<i64: 1, 128>}, {pipeline_mode = #tpu.pipeline_mode<synchronous>, transform_indices = @transform_3, window_bounds = array<i64: 1, 128>}, {pipeline_mode = #tpu.pipeline_mode<synchronous>, transform_indices = @transform_4, window_bounds = array<i64: 128, 256>}, {pipeline_mode = #tpu.pipeline_mode<synchronous>, transform_indices = @transform_5, window_bounds = array<i64: 1, 256>}, {pipeline_mode = #tpu.pipeline_mode<synchronous>, transform_indices = @transform_6, window_bounds = array<i64: 128, 128>}, {pipeline_mode = #tpu.pipeline_mode<synchronous>, transform_indices = @transform_7, window_bounds = array<i64: 1, 128>}, {transform_indices = @transform_8, window_bounds = array<i64: 16, 128>}, {transform_indices = @transform_9, window_bounds = array<i64: 16, 128>}, {transform_indices = @transform_10, window_bounds = array<i64: 16, 128>}]} {
    %c0 = arith.constant 0 : index
    %c0_0 = arith.constant 0 : index
    %0 = vector.load %arg1[%c0, %c0_0] : memref<16x128xf32, #tpu.memory_space<vmem>>, vector<16x128xf32>
    %c0_1 = arith.constant 0 : index
    %c0_2 = arith.constant 0 : index
    %1 = vector.load %arg3[%c0_1, %c0_2] : memref<1x128xf32, #tpu.memory_space<vmem>>, vector<1x128xf32>
    %c0_3 = arith.constant 0 : index
    %c0_4 = arith.constant 0 : index
    %2 = vector.load %arg4[%c0_3, %c0_4] : memref<1x128xf32, #tpu.memory_space<vmem>>, vector<1x128xf32>
    %cst = arith.constant dense<0.000000e+00> : vector<16xf32>
    %3 = vector.multi_reduction <add>, %0, %cst [1] : vector<16x128xf32> to vector<16xf32>
    %4 = vector.shape_cast %3 : vector<16xf32> to vector<16x1xf32>
    %cst_5 = arith.constant 1.280000e+02 : f32
    %5 = vector.broadcast %cst_5 : f32 to vector<16x1xf32>
    %6 = arith.divf %4, %5 : vector<16x1xf32>
    %7 = vector.broadcast %6 : vector<16x1xf32> to vector<16x128xf32>
    %8 = arith.subf %0, %7 : vector<16x128xf32>
    %9 = arith.mulf %8, %8 : vector<16x128xf32>
    %cst_6 = arith.constant dense<0.000000e+00> : vector<16xf32>
    %10 = vector.multi_reduction <add>, %9, %cst_6 [1] : vector<16x128xf32> to vector<16xf32>
    %11 = vector.shape_cast %10 : vector<16xf32> to vector<16x1xf32>
    %cst_7 = arith.constant 1.280000e+02 : f32
    %12 = vector.broadcast %cst_7 : f32 to vector<16x1xf32>
    %13 = arith.divf %11, %12 : vector<16x1xf32>
    %cst_8 = arith.constant 9.99999974E-6 : f32
    %14 = vector.broadcast %cst_8 : f32 to vector<16x1xf32>
    %15 = arith.addf %13, %14 : vector<16x1xf32>
    %16 = math.rsqrt %15 : vector<16x1xf32>
    %17 = vector.broadcast %16 : vector<16x1xf32> to vector<16x128xf32>
    %18 = arith.mulf %8, %17 : vector<16x128xf32>
    %19 = vector.broadcast %1 : vector<1x128xf32> to vector<16x128xf32>
    %20 = arith.mulf %18, %19 : vector<16x128xf32>
    %21 = vector.broadcast %2 : vector<1x128xf32> to vector<16x128xf32>
    %22 = arith.addf %20, %21 : vector<16x128xf32>
    %c0_9 = arith.constant 0 : index
    %c0_10 = arith.constant 0 : index
    %23 = vector.load %arg2[%c0_9, %c0_10] : memref<16x128xf32, #tpu.memory_space<vmem>>, vector<16x128xf32>
    %24 = arith.addf %22, %23 : vector<16x128xf32>
    %25 = arith.truncf %24 : vector<16x128xf32> to vector<16x128xbf16>
    %c0_11 = arith.constant 0 : index
    %c0_12 = arith.constant 0 : index
    %26 = vector.load %arg5[%c0_11, %c0_12] : memref<128x256xbf16, #tpu.memory_space<vmem>>, vector<128x256xbf16>
    %cst_13 = arith.constant dense<0.000000e+00> : vector<16x256xf32>
    %27 = tpu.matmul %25, %26, %cst_13 {dimension_numbers = #tpu.dot_dimension_numbers<[1], [0], [0], [1], [0, 0, 1, 1], [], []>} : vector<16x128xbf16>, vector<128x256xbf16>, vector<16x256xf32> -> vector<16x256xf32>
    %c0_14 = arith.constant 0 : index
    %c0_15 = arith.constant 0 : index
    %28 = vector.load %arg6[%c0_14, %c0_15] : memref<1x256xf32, #tpu.memory_space<vmem>>, vector<1x256xf32>
    %29 = vector.broadcast %28 : vector<1x256xf32> to vector<16x256xf32>
    %30 = arith.addf %27, %29 : vector<16x256xf32>
    %31 = arith.truncf %22 : vector<16x128xf32> to vector<16x128xbf16>
    %c0_16 = arith.constant 0 : index
    %c0_17 = arith.constant 0 : index
    %32 = vector.load %arg7[%c0_16, %c0_17] : memref<128x128xbf16, #tpu.memory_space<vmem>>, vector<128x128xbf16>
    %cst_18 = arith.constant dense<0.000000e+00> : vector<16x128xf32>
    %33 = tpu.matmul %31, %32, %cst_18 {dimension_numbers = #tpu.dot_dimension_numbers<[1], [0], [0], [1], [0, 0, 1, 1], [], []>} : vector<16x128xbf16>, vector<128x128xbf16>, vector<16x128xf32> -> vector<16x128xf32>
    %c0_19 = arith.constant 0 : index
    %c0_20 = arith.constant 0 : index
    %34 = vector.load %arg8[%c0_19, %c0_20] : memref<1x128xf32, #tpu.memory_space<vmem>>, vector<1x128xf32>
    %35 = vector.broadcast %34 : vector<1x128xf32> to vector<16x128xf32>
    %36 = arith.addf %33, %35 : vector<16x128xf32>
    %37 = vector.extract_strided_slice %30 {offsets = [0, 0], sizes = [16, 128], strides = [1, 1]} : vector<16x256xf32> to vector<16x128xf32>
    %c0_21 = arith.constant 0 : index
    %c0_22 = arith.constant 0 : index
    %38 = vector.load %arg9[%c0_21, %c0_22] : memref<16x128xf32, #tpu.memory_space<vmem>>, vector<16x128xf32>
    tpu.vector_store %arg9[%c0_21, %c0_22], %37 {strides = array<i32>} : memref<16x128xf32, #tpu.memory_space<vmem>>, vector<16x128xf32>,
    %39 = vector.extract_strided_slice %30 {offsets = [0, 128], sizes = [16, 128], strides = [1, 1]} : vector<16x256xf32> to vector<16x128xf32>
    %c0_23 = arith.constant 0 : index
    %c0_24 = arith.constant 0 : index
    %40 = vector.load %arg10[%c0_23, %c0_24] : memref<16x128xf32, #tpu.memory_space<vmem>>, vector<16x128xf32>
    tpu.vector_store %arg10[%c0_23, %c0_24], %39 {strides = array<i32>} : memref<16x128xf32, #tpu.memory_space<vmem>>, vector<16x128xf32>,
    %c0_25 = arith.constant 0 : index
    %c0_26 = arith.constant 0 : index
    %41 = vector.load %arg11[%c0_25, %c0_26] : memref<16x128xf32, #tpu.memory_space<vmem>>, vector<16x128xf32>
    tpu.vector_store %arg11[%c0_25, %c0_26], %36 {strides = array<i32>} : memref<16x128xf32, #tpu.memory_space<vmem>>, vector<16x128xf32>,
    return
  }
  func.func @transform_0(%arg0: i32) -> (i32, i32) {
    %c0_i32 = arith.constant 0 : i32
    %c0_i32_0 = arith.constant 0 : i32
    return %arg0, %c0_i32 : i32, i32
  }
  func.func @transform_1(%arg0: i32) -> (i32, i32) {
    %c0_i32 = arith.constant 0 : i32
    %c0_i32_0 = arith.constant 0 : i32
    return %arg0, %c0_i32 : i32, i32
  }
  func.func @transform_2(%arg0: i32) -> (i32, i32) {
    %c0_i32 = arith.constant 0 : i32
    %c0_i32_0 = arith.constant 0 : i32
    %c0_i32_1 = arith.constant 0 : i32
    return %c0_i32, %c0_i32_0 : i32, i32
  }
  func.func @transform_3(%arg0: i32) -> (i32, i32) {
    %c0_i32 = arith.constant 0 : i32
    %c0_i32_0 = arith.constant 0 : i32
    %c0_i32_1 = arith.constant 0 : i32
    return %c0_i32, %c0_i32_0 : i32, i32
  }
  func.func @transform_4(%arg0: i32) -> (i32, i32) {
    %c0_i32 = arith.constant 0 : i32
    %c0_i32_0 = arith.constant 0 : i32
    %c0_i32_1 = arith.constant 0 : i32
    return %c0_i32, %c0_i32_0 : i32, i32
  }
  func.func @transform_5(%arg0: i32) -> (i32, i32) {
    %c0_i32 = arith.constant 0 : i32
    %c0_i32_0 = arith.constant 0 : i32
    %c0_i32_1 = arith.constant 0 : i32
    return %c0_i32, %c0_i32_0 : i32, i32
  }
  func.func @transform_6(%arg0: i32) -> (i32, i32) {
    %c0_i32 = arith.constant 0 : i32
    %c0_i32_0 = arith.constant 0 : i32
    %c0_i32_1 = arith.constant 0 : i32
    return %c0_i32, %c0_i32_0 : i32, i32
  }
  func.func @transform_7(%arg0: i32) -> (i32, i32) {
    %c0_i32 = arith.constant 0 : i32
    %c0_i32_0 = arith.constant 0 : i32
    %c0_i32_1 = arith.constant 0 : i32
    return %c0_i32, %c0_i32_0 : i32, i32
  }
  func.func @transform_8(%arg0: i32) -> (i32, i32) {
    %c0_i32 = arith.constant 0 : i32
    %c0_i32_0 = arith.constant 0 : i32
    return %arg0, %c0_i32 : i32, i32
  }
  func.func @transform_9(%arg0: i32) -> (i32, i32) {
    %c0_i32 = arith.constant 0 : i32
    %c0_i32_0 = arith.constant 0 : i32
    return %arg0, %c0_i32 : i32, i32
  }
  func.func @transform_10(%arg0: i32) -> (i32, i32) {
    %c0_i32 = arith.constant 0 : i32
    %c0_i32_0 = arith.constant 0 : i32
    return %arg0, %c0_i32 : i32, i32
  }
}

</mosaic_0001>

<bundles_post_ra>
// kernel: tpu_custom_call.1
= control target key start
LH: loop header
LB: loop body
LE: loop exit
PB: predicated region body
PF: predicated region fallthrough
CT: control target
= control target key end

     0   :  { %s1975_s0 = inlined_call_operand.hbm [shape: f32[32,128], index: 0, kind: input, shape index: {}]   ;;  %s1976_s1 = inlined_call_operand.hbm [shape: f32[32,128], index: 1, kind: input, shape index: {}]   ;;  %s1977_s2 = inlined_call_operand.vmem [shape: f32[1,128], index: 2, kind: input, shape index: {}]   ;;  %s1978_s3 = inlined_call_operand.vmem [shape: f32[1,128], index: 3, kind: input, shape index: {}]   ;;  %s1979_s4 = inlined_call_operand.hbm [shape: bf16[128,256], index: 4, kind: input, shape index: {}]   ;;  %s1980_s5 = inlined_call_operand.vmem [shape: f32[1,256], index: 5, kind: input, shape index: {}]   ;;  %s1981_s6 = inlined_call_operand.hbm [shape: bf16[128,128], index: 6, kind: input, shape index: {}]   ;;  %s1982_s7 = inlined_call_operand.vmem [shape: f32[1,128], index: 7, kind: input, shape index: {}]   ;;  %s1983_s8 = inlined_call_operand.hbm [shape: f32[32,128], index: 8, kind: output, shape index: {0}]   ;;  %s1984_s9 = inlined_call_operand.hbm [shape: f32[32,128], index: 9, kind: output, shape index: {1}]   ;;  %s1985_s10 = inlined_call_operand.hbm [shape: f32[32,128], index: 10, kind: output, shape index: {2}]  }
   0x1   :  { %1998 = sst [smem:[#allocation24_spill]] %s1975_s0 }
   0x2   :  { %1999 = sst [smem:[#allocation25_spill]] %s1979_s4 }
   0x3   :  { %2000 = sst [smem:[#allocation26_spill]] %s1981_s6 }
   0x4   :  { %16 = vsyncpa [#allocation3], 0 }
   0x5   :  { %18 = vsyncpa [#allocation3 + $0x1], 0 }
   0x6   :  { %19 = vsyncpa [#allocation6], 0 }
   0x7   :  { %21 = vsyncpa [#allocation6 + $0x1], 0 }
   0x8   :  { %22 = vsyncpa [#allocation9], 0 }
   0x9   :  { %23 = vsyncpa [#allocation4], 0 }
   0xa   :  { %25 = vsyncpa [#allocation4 + $0x1], 0 }
   0xb   :  { %26 = vsyncpa [#allocation12], 0 }
   0xc   :  { %28 = vsyncpa [#allocation12 + $0x1], 0  ;;  %s1566_s13 = smov 0   ;;  %s1568_s14 = smov 0  }
   0xd   :  { %s1570_s15 = smov 0   ;;  %s1572_s16 = smov 0  }
   0xe LB: > { %2001 = sst [smem:[#allocation20_spill]] %s1481_s13  ;;  %s1587_s17 = sadd.s32 4294967295, %s1493_s16   ;;  %s1493_s16 = sphi %s1572_s16, %s2033_s16   ;;  %s1489_s15 = sphi %s1570_s15, %s2030_s15   ;;  %s1485_s14 = sphi %s1568_s14, %s2032_s14   ;;  %s1481_s13 = sphi %s1566_s13, %s2031_s13  }
   0xf   : > { %2002 = sst [smem:[#allocation21_spill]] %s1489_s15  ;;  %s1987_s18 = sadd.s32 4294967294, %s1493_s16  }
  0x10   : > { %p54_p0 = scmp.ne.s32.totalorder %s1485_s14, %s1481_s13  ;;  %p1986_p1 = scmp.eq.s32.totalorder %s1587_s17, 0 }
  0x11   : > { %p236_p3 = scmp.eq.s32.totalorder %s1987_s18, 1  ;;  %p1022_p5 = scmp.ge.s32.totalorder %s1493_s16, 1 }
  0x12   : > { %p1598_p4 = por %p1986_p1, %p54_p0  ;;  %p295_p7 = scmp.lt.s32.totalorder %s1493_s16, 3 }
  0x13   : > { %p1603_p6 = por %p236_p3, %p54_p0  ;;  %s1495_s22 = smov [#allocation7]  }
  0x14   : > { %s2003_s19 = scalar_select %p1598_p4, 1, 0 }
  0x15   : > { %s2004_s20 = scalar_select %p1603_p6, 1, 0 }
  0x16   : > { %p1608_p8 = pnand %p1022_p5, %p295_p7  ;;  %s313_s23 = sshll.u32 %s1495_s22, 4  ;;  %s1612_s23 = int_to_ptr.vmem [resolvable:$true] %s313_s23 }
  0x17   : > { %2005 = sst [smem:[#allocation22_spill]] %s2004_s20  ;;  %s1496_s25 = smov [#allocation8]  }
  0x18   : > { %p1130_p9 = pneg %p1608_p8  ;;  %s329_s26 = sshll.u32 %s1496_s25, 4  ;;  %s1623_s26 = int_to_ptr.vmem [resolvable:$true] %s329_s26 }
  0x19   : > { %s2008_s4 = sld [smem:[#allocation25_spill]] }
  0x1a   : > { %p1619_p11 = pnand %p1130_p9, %p1986_p1 }
  0x1c   : > { %p1241_p13 = pneg %p1619_p11 }
  0x1f   : > { %s1239_s29 = scalar_lea.hbm %s2008_s4, 2048 }
  0x20   : > { %p1240_p12 = scmp.ne.s32.totalorder %s2008_s4, %s1239_s29  ;;  %p1246_p5 = scmp.lt.u32.totalorder %s1239_s29, %s2008_s4 }
  0x22   : > { %p1242_p0 = pnand %p1241_p13, %p1240_p12 }
  0x24   : > { %p1243_p3 = pneg %p1242_p0 }
  0x26   : > { %p1248_p7 = pnand %p1246_p5, %p1243_p3 }
  0x28   : > { %1251 = shalt.err (!%p1248_p7)
}
  0x29   : > { %s1252_s25 = scalar_lea.vmem %s1612_s23, 2048  ;;  %p1260_p2 = scmp.lt.s32.totalorder %s1612_s23, %s1612_s23 }
  0x2a   : > { %p1253_p9 = scmp.ne.s32.totalorder %s1612_s23, %s1252_s25  ;;  %p1261_p12 = scmp.lt.s32.totalorder %s1252_s25, %s1252_s25 }
  0x2c   : > { %p1255_p10 = pnand %p1253_p9, %p1241_p13  ;;  %p1262_p0 = por %p1261_p12, %p1260_p2 }
  0x2e   : > { %p1256_p1 = pneg %p1255_p10 }
  0x30   : > { %p1263_p6 = pnand %p1262_p0, %p1256_p1 }
  0x32   : > { %1266 = shalt.err (!%p1263_p6)
}
  0x33   : > { %s1990_s27 = smov 128   ;;  %s1992_s28 = smov 8  }
  0x34   : > { %1133 = dma.hbm_to_vmem [thread:$0]  (!%p1619_p11), %s2008_s4, 2048, %s1612_s23, [#allocation6], %s1990_s27, %s1990_s27, %s1992_s28  }
  0x35   : > { %s2009_s6 = sld [smem:[#allocation26_spill]] }
  0x3b   : > { %s1267_s22 = scalar_lea.hbm %s2009_s6, 1024 }
  0x3c   : > { %p1268_p1 = scmp.ne.s32.totalorder %s2009_s6, %s1267_s22  ;;  %p1274_p10 = scmp.lt.u32.totalorder %s1267_s22, %s2009_s6 }
  0x3e   : > { %p1270_p2 = pnand %p1268_p1, %p1241_p13 }
  0x40   : > { %p1271_p6 = pneg %p1270_p2 }
  0x42   : > { %p1276_p3 = pnand %p1274_p10, %p1271_p6 }
  0x44   : > { %1279 = shalt.err (!%p1276_p3)
}
  0x45   : > { %s1280_s23 = scalar_lea.vmem %s1623_s26, 1024  ;;  %p1288_p12 = scmp.lt.s32.totalorder %s1623_s26, %s1623_s26 }
  0x46   : > { %p1281_p5 = scmp.ne.s32.totalorder %s1623_s26, %s1280_s23  ;;  %p1289_p0 = scmp.lt.s32.totalorder %s1280_s23, %s1280_s23 }
  0x48   : > { %p1283_p7 = pnand %p1281_p5, %p1241_p13  ;;  %p1290_p1 = por %p1289_p0, %p1288_p12 }
  0x4a   : > { %p1284_p9 = pneg %p1283_p7 }
  0x4c   : > { %p1291_p2 = pnand %p1290_p1, %p1284_p9 }
  0x4e   : > { %1294 = shalt.err (!%p1291_p2)
}
  0x4f   : > { %s1499_s13 = smov 64   ;;  %s1500_s18 = smov 4  }
  0x50   : > { %1136 = dma.hbm_to_vmem [thread:$0]  (!%p1619_p11), %s2009_s6, 1024, %s1623_s26, [#allocation9], %s1499_s13, %s1499_s13, %s1500_s18  }
  0x51   : > { %s1681_s30 = sadd.s32 1, %s1493_s16   ;;  %s41_s12 = sadd.s32 1, %s1489_s15 }
  0x52   : > { %s38_s11 = ssub.s32 %s1493_s16, %s1681_s30  ;;  %p48_p6 = scmp.ne.s32.totalorder %s1489_s15, %s1485_s14 }
  0x53   : > { %p39_p13 = scmp.eq.s32.totalorder %s38_s11, 0  ;;  %p49_p10 = scmp.eq.s32.totalorder %s1493_s16, 0 }
  0x54   : > { %p2011_p5 = scmp.eq.s32.totalorder %s1587_s17, 1  ;;  %p1156_p9 = scmp.lt.s32.totalorder %s1493_s16, 2 }
  0x55   : > { %s1690_s22 = scalar_select %p39_p13, %s1489_s15, %s41_s12  }
  0x56   : > { %p50_p3 = por %p49_p10, %p48_p6  ;;  %p1694_p7 = por %p2011_p5, %p48_p6 }
  0x57   : > { %2010 = sst [smem:[#allocation23_spill]] %s1690_s22  ;;  %s346_s24 = sand.u32 1, %s1489_s15  }
  0x58   : > { %s2012_s25 = scalar_select %p1694_p7, 1, 0 }
  0x59   : > { %s1026_s23 = sshll.u32 %s346_s24, 4  ;;  %s1078_s26 = sshll.u32 %s1493_s16, 8 }
  0x5a   : > { %s2013_s0 = sld [smem:[#allocation24_spill]]  ;;  %s350_s29 = scalar_lea.vmem [#allocation2], %s1026_s23 }
  0x5b   : > { %s357_s11 = sshll.u32 %s350_s29, 4  ;;  %p1708_p11 = pnand %p1156_p9, %p50_p3  ;;  %s1706_s11 = int_to_ptr.vmem [resolvable:$true] %s357_s11 }
  0x5c   : > { %s1715_s13 = scalar_lea.hbm %s1976_s1, %s1078_s26  ;;  %s371_s18 = scalar_lea.vmem [#allocation5], %s1026_s23 }
  0x5d   : > { %s1717_s4 = sshll.u32 %s371_s18, 4  ;;  %s1719_s6 = scalar_lea.sflag [#allocation3], %s346_s24  ;;  %s1751_s4 = int_to_ptr.vmem [resolvable:$true] %s1717_s4 }
  0x5e   : > { %p1297_p0 = pneg %p1708_p11 }
  0x60   : > { %s1704_s20 = scalar_lea.hbm %s2013_s0, %s1078_s26  ;;  %s1300_s27 = scalar_lea.hbm %s2013_s0, 512 }
  0x61   : > { %s1295_s29 = scalar_lea.hbm %s1704_s20, 256  ;;  %p1301_p13 = scmp.lt.u32.totalorder %s1704_s20, %s2013_s0 }
  0x62   : > { %p1296_p12 = scmp.ne.s32.totalorder %s1704_s20, %s1295_s29  ;;  %p1302_p6 = scmp.lt.u32.totalorder %s1300_s27, %s1295_s29 }
  0x63   : > { %p1304_p3 = scmp.lt.u32.totalorder %s1295_s29, %s1704_s20 }
  0x64   : > { %p1298_p1 = pnand %p1297_p0, %p1296_p12  ;;  %p1303_p10 = por %p1302_p6, %p1301_p13 }
  0x66   : > { %p1299_p2 = pneg %p1298_p1  ;;  %p1305_p5 = por %p1304_p3, %p1303_p10 }
  0x68   : > { %p1306_p9 = pnand %p1305_p5, %p1299_p2 }
  0x6a   : > { %1309 = shalt.err (!%p1306_p9)
}
  0x6b   : > { %s1310_s24 = scalar_lea.vmem %s1706_s11, 256  ;;  %s1501_s15 = smov [#allocation2]  }
  0x6c   : > { %p1311_p12 = scmp.ne.s32.totalorder %s1706_s11, %s1310_s24  ;;  %s1315_s22 = sshll.u32 %s1501_s15, 4  ;;  %s1316_s22 = int_to_ptr.vmem [resolvable:$false] %s1315_s22 }
  0x6d   : > { %s1317_s23 = scalar_lea.vmem %s1316_s22, 512  ;;  %p1318_p4 = scmp.lt.s32.totalorder %s1706_s11, %s1316_s22 }
  0x6e   : > { %p1313_p1 = pnand %p1311_p12, %p1297_p0  ;;  %p1319_p13 = scmp.lt.s32.totalorder %s1317_s23, %s1310_s24 }
  0x70   : > { %p1314_p7 = pneg %p1313_p1  ;;  %p1320_p6 = por %p1319_p13, %p1318_p4 }
  0x72   : > { %p1321_p10 = pnand %p1320_p6, %p1314_p7 }
  0x74   : > { %1324 = shalt.err (!%p1321_p10)
}
  0x75   : > { %s2015_s18 = smov 8   ;;  %s2016_s29 = smov 128  }
  0x76   : > { %1140 = dma.hbm_to_vmem [thread:$0]  (!%p1708_p11), %s1704_s20, 256, %s1706_s11, %s1719_s6, %s2016_s29, %s2016_s29, %s2015_s18  }
  0x77   : > { %s367_s27 = sand.u32 1, %s1493_s16   ;;  %s1325_s26 = scalar_lea.hbm %s1715_s13, 256 }
  0x78   : > { %s1754_s28 = scalar_lea.sflag [#allocation6], %s367_s27  ;;  %p1326_p4 = scmp.ne.s32.totalorder %s1715_s13, %s1325_s26 }
  0x79   : > { %s1330_s22 = scalar_lea.hbm %s1976_s1, 512  ;;  %p1331_p3 = scmp.lt.u32.totalorder %s1715_s13, %s1976_s1 }
  0x7a   : > { %p1328_p7 = pnand %p1326_p4, %p1297_p0  ;;  %p1332_p5 = scmp.lt.u32.totalorder %s1330_s22, %s1325_s26 }
  0x7b   : > { %p1334_p12 = scmp.lt.u32.totalorder %s1325_s26, %s1715_s13 }
  0x7c   : > { %p1329_p2 = pneg %p1328_p7  ;;  %p1333_p9 = por %p1332_p5, %p1331_p3 }
  0x7e   : > { %p1335_p1 = por %p1334_p12, %p1333_p9 }
  0x80   : > { %p1336_p13 = pnand %p1335_p1, %p1329_p2 }
  0x82   : > { %1339 = shalt.err (!%p1336_p13)
}
  0x83   : > { %s1340_s6 = scalar_lea.vmem %s1751_s4, 256  ;;  %s1502_s20 = smov [#allocation5]  }
  0x84   : > { %p1341_p6 = scmp.ne.s32.totalorder %s1751_s4, %s1340_s6  ;;  %s1345_s11 = sshll.u32 %s1502_s20, 4  ;;  %s1346_s11 = int_to_ptr.vmem [resolvable:$false] %s1345_s11 }
  0x85   : > { %s1347_s0 = scalar_lea.vmem %s1346_s11, 512  ;;  %p1348_p7 = scmp.lt.s32.totalorder %s1751_s4, %s1346_s11 }
  0x86   : > { %p1343_p10 = pnand %p1341_p6, %p1297_p0  ;;  %p1349_p3 = scmp.lt.s32.totalorder %s1347_s0, %s1340_s6 }
  0x88   : > { %p1344_p4 = pneg %p1343_p10  ;;  %p1350_p5 = por %p1349_p3, %p1348_p7 }
  0x8a   : > { %p1351_p9 = pnand %p1350_p5, %p1344_p4 }
  0x8c   : > { %1354 = shalt.err (!%p1351_p9)
}
  0x8d   : > { %1143 = dma.hbm_to_vmem [thread:$0]  (!%p1708_p11), %s1715_s13, 256, %s1751_s4, %s1754_s28, %s2016_s29, %s2016_s29, %s2015_s18  }
  0x8e   : > { %390 = sbr.rel (%p1608_p8) target bundleno = 757 (0x2f5), region = 52  ;;  %s1786_s27 = sand.u32 (!%p1608_p8), 1, %s1485_s14  }
  0x8f   : > { %s1789_s26 = sshll.u32 (!%p1608_p8), %s1786_s27, 4  ;;  %s393_s12 = scalar_lea.sflag (!%p1608_p8), [#allocation3], %s1786_s27 }
  0x90   : > { %s396_s24 = scalar_lea.vmem (!%p1608_p8), [#allocation2], %s1789_s26  ;;  %p2017_p0 = scmp.ne.s32.totalorder (!%p1608_p8), %s2003_s19, 0 }
  0x95   : > { %1456 = dma.done.wait (%p2017_p0), %s393_s12, 256  }
  0x96   : > { %1458 = vsyncadd (%p2017_p0), %s393_s12, 4294967040  ;;  %s1997_s4 = sand.u32 1, %s1587_s17   ;;  %s405_s13 = scalar_lea.vmem [#allocation5], %s1789_s26 }
  0x97   : > { %s402_s21 = scalar_lea.sflag [#allocation6], %s1997_s4 }
  0x98   : > { %1460 = dma.done.wait (%p2017_p0), %s402_s21, 256  }
  0x99   : > { %1462 = vsyncadd (%p2017_p0), %s402_s21, 4294967040  ;;  %p2018_p8 = scmp.eq.s32.totalorder %s1587_s17, 0 }
  0x9b   : > { %1464 = dma.done.wait (%p2018_p8), [#allocation6], 2048   ;;  %p2019_p11 = pmov %p2018_p8 }
  0x9c   : > { %p2020_p2 = pmov %p2018_p8 }
  0x9d   : > { %1466 = vsyncadd (%p2019_p11), [#allocation6], 4294965248 }
  0x9e   : > { %1468 = dma.done.wait (%p2020_p2), [#allocation9], 1024   ;;  %p2021_p12 = pmov %p2020_p2 }
  0x9f   : > { %v471_v0 = vld [vmem:[%s396_s24] sm:$0xff]  ;;  %v472_v1 = vld [vmem:[%s396_s24 + $0x8] sm:$0xff]  ;;  %v1503_v5 = vmov 0.0   ;;  %vm1504_vm0 = vmmov 0   ;;  %v1505_v35 = vmov 0   ;;  %v537_v58 = vlaneseq  ;;  %s1840_s20 = scalar_lea.vmem [#allocation10], %s1789_s26 }
  0xa0   : > { %1470 = vsyncadd (%p2021_p12), [#allocation9], 4294966272  ;;  %475 = vadd.xlane.f32.xlu0 %v471_v0  ;;  %v1203_v2 = vld [vmem:[#allocation8] sm:$0xff]   ;;  %1092 = vmatprep.subr.bf16.mxu1 %v1503_v5  ;;  %v1207_v14 = vld [vmem:[#allocation8 + $0x8] sm:$0xff]   ;;  %s813_s11 = sshll.u32 %s1840_s20, 4  ;;  %s1844_s0 = scalar_lea.vmem [#allocation11], %s1789_s26  ;;  %s1849_s11 = int_to_ptr.vmem [resolvable:$true] %s813_s11 }
  0xa1   : > { %v1204_v3 = vld [vmem:[#allocation7 + $0x4] ss:$8 sps:$4 sm:$0xff]   ;;  %v1206_v4 = vld [vmem:[#allocation7] ss:$8 sps:$4 sm:$0xff]   ;;  %1093 = vmatpush3.bf16.msra.mxu1 %v1203_v2  ;;  %v1208_v15 = vld [vmem:[#allocation7 + $0x14] ss:$8 sps:$4 sm:$0xff]   ;;  %1108 = vmatprep.mubr.msk.bf16.mxu1 %vm1504_vm0, %v1503_v5 }
  0xa2   : > { %627 = vmatprep.subr.bf16.mxu0 %v1204_v3  ;;  %1094 = vmatprep.subr.bf16.mxu1 %v1503_v5  ;;  %v1210_v16 = vld [vmem:[#allocation7 + $0x10] ss:$8 sps:$4 sm:$0xff]   ;;  %v1212_v18 = vld [vmem:[#allocation7 + $0x24] ss:$8 sps:$4 sm:$0xff]   ;;  %v1214_v19 = vld [vmem:[#allocation7 + $0x20] ss:$8 sps:$4 sm:$0xff]  }
  0xa3   : > { %628 = vmatpush1.bf16.msra.mxu0 %v1206_v4  ;;  %v1211_v17 = vld [vmem:[#allocation8 + $0x10] sm:$0xff]   ;;  %v1215_v20 = vld [vmem:[#allocation8 + $0x18] sm:$0xff]   ;;  %v1219_v23 = vld [vmem:[#allocation8 + $0x20] sm:$0xff]   ;;  %659 = vmatprep.mubr.bf16.mxu0 %v1505_v35  ;;  %v538_v59 = vshrl.u32 %v537_v58, 7  ;;  %s829_s12 = sshll.u32 %s1844_s0, 4  ;;  %s464_s24 = scalar_lea.vmem [#allocation13], %s1789_s26  ;;  %s1851_s12 = int_to_ptr.vmem [resolvable:$true] %s829_s12 }
  0xa4   : > { %477 = vadd.xlane.f32.xlu0 %v472_v1  ;;  %629 = vmatprep.subr.bf16.mxu0 %v1208_v15  ;;  %v1216_v21 = vld [vmem:[#allocation7 + $0x34] ss:$8 sps:$4 sm:$0xff]   ;;  %v1218_v22 = vld [vmem:[#allocation7 + $0x30] ss:$8 sps:$4 sm:$0xff]   ;;  %v1220_v24 = vld [vmem:[#allocation7 + $0x44] ss:$8 sps:$4 sm:$0xff]  }
  0xa5   : > { %1095 = vmatpush3.bf16.msra.mxu1 %v1207_v14  ;;  %v1222_v25 = vld [vmem:[#allocation7 + $0x40] ss:$8 sps:$4 sm:$0xff]   ;;  %v1224_v26 = vld [vmem:[#allocation7 + $0x54] ss:$8 sps:$4 sm:$0xff]   ;;  %v1226_v28 = vld [vmem:[#allocation7 + $0x50] ss:$8 sps:$4 sm:$0xff]  }
  0xa6   : > { %1096 = vmatprep.subr.bf16.mxu1 %v1503_v5  ;;  %v1223_v27 = vld [vmem:[#allocation8 + $0x28] sm:$0xff]   ;;  %v1227_v30 = vld [vmem:[#allocation8 + $0x30] sm:$0xff]   ;;  %v1231_v33 = vld [vmem:[#allocation8 + $0x38] sm:$0xff]   ;;  %v539_v60 = vsub.s32 0, %v538_v59  ;;  %v543_v62 = vsub.s32 1, %v538_v59  ;;  %s845_s21 = sshll.u32 %s464_s24, 4  ;;  %s1865_s21 = int_to_ptr.vmem [resolvable:$true] %s845_s21 }
  0xa7   : > { %630 = vmatpush1.bf16.msra.mxu0 %v1210_v16  ;;  %v1228_v29 = vld [vmem:[#allocation7 + $0x64] ss:$8 sps:$4 sm:$0xff]   ;;  %v1230_v31 = vld [vmem:[#allocation7 + $0x60] ss:$8 sps:$4 sm:$0xff]   ;;  %v1232_v32 = vld [vmem:[#allocation7 + $0x74] ss:$8 sps:$4 sm:$0xff]  }
  0xa8   : > { %631 = vmatprep.subr.bf16.mxu0 %v1212_v18  ;;  %v1234_v34 = vld [vmem:[#allocation7 + $0x70] ss:$8 sps:$4 sm:$0xff]   ;;  %v1040_v43 = vld [vmem:[%s1977_s2] ss:$0 sm:$0xff]  ;;  %s1355_s26 = scalar_lea.vmem %s1849_s11, 256  ;;  %p2022_p13 = scmp.ne.s32.totalorder %s2012_s25, 0 }
  0xa9   : > { %1097 = vmatpush3.bf16.msra.mxu1 %v1211_v17  ;;  %v1041_v47 = vld [vmem:[%s1978_s3] ss:$0 sm:$0xff]  ;;  %v515_v52 = vld [vmem:[%s405_s13 + $0x8] sm:$0xff]  ;;  %p1356_p1 = scmp.ne.s32.totalorder %s1849_s11, %s1355_s26  ;;  %s1506_s19 = smov [#allocation10]  }
  0xaa   : > { %1098 = vmatprep.subr.bf16.mxu1 %v1503_v5  ;;  %v514_v51 = vld [vmem:[%s405_s13] sm:$0xff]  ;;  %s1080_s13 = sshll.u32 %s1587_s17, 8  ;;  %s1359_s4 = sshll.u32 %s1506_s19, 4  ;;  %s1360_s4 = int_to_ptr.vmem [resolvable:$false] %s1359_s4 }
  0xab   : > { %632 = vmatpush1.bf16.msra.mxu0 %v1214_v19  ;;  %v535_v61 = vld [vmem:[%s1980_s5] sm:$0x3]  ;;  %s1857_s18 = scalar_lea.hbm %s1983_s8, %s1080_s13  ;;  %s1863_s15 = scalar_lea.hbm %s1984_s9, %s1080_s13 }
  0xac   : > { %633 = vmatprep.subr.bf16.mxu0 %v1216_v21  ;;  %v1058_v63 = vld [vmem:[%s1982_s7] ss:$0 sm:$0xff]  ;;  %v544_v2 = vrot.slane %v535_v61, %v543_v62  ;;  %s1871_s6 = scalar_lea.hbm %s1985_s10, %s1080_s13  ;;  %p1357_p6 = pnand %p1356_p1, %p2022_p13 }
  0xad   : > { %1099 = vmatpush3.bf16.msra.mxu1 %v1215_v20  ;;  %s1361_s29 = scalar_lea.vmem %s1360_s4, 512  ;;  %p1362_p4 = scmp.lt.s32.totalorder %s1849_s11, %s1360_s4 }
  0xae   : > { %1100 = vmatprep.subr.bf16.mxu1 %v1503_v5  ;;  %p1358_p10 = pneg %p1357_p6  ;;  %p1363_p7 = scmp.lt.s32.totalorder %s1361_s29, %s1355_s26 }
  0xaf   : > { %634 = vmatpush1.bf16.msra.mxu0 %v1218_v22 }
  0xb0   : > { %635 = vmatprep.subr.bf16.mxu0 %v1220_v24  ;;  %p1364_p3 = por %p1363_p7, %p1362_p4 }
  0xb1   : > { %1101 = vmatpush3.bf16.msra.mxu1 %v1219_v23 }
  0xb2   : > { %1102 = vmatprep.subr.bf16.mxu1 %v1503_v5  ;;  %p1365_p5 = pnand %p1364_p3, %p1358_p10 }
  0xb3   : > { %636 = vmatpush1.bf16.msra.mxu0 %v1222_v25 }
  0xb4   : > { %637 = vmatprep.subr.bf16.mxu0 %v1224_v26 }
  0xb5   : > { %1103 = vmatpush3.bf16.msra.mxu1 %v1223_v27 }
  0xb6   : > { %1104 = vmatprep.subr.bf16.mxu1 %v1503_v5 }
  0xb7   : > { %638 = vmatpush1.bf16.msra.mxu0 %v1226_v28 }
  0xb8   : > { %639 = vmatprep.subr.bf16.mxu0 %v1228_v29 }
  0xb9   : > { %1105 = vmatpush3.bf16.msra.mxu1 %v1227_v30 }
  0xba   : > { %1106 = vmatprep.subr.bf16.mxu1 %v1503_v5 }
  0xbb   : > { %640 = vmatpush1.bf16.msra.mxu0 %v1230_v31 }
  0xbc   : > { %641 = vmatprep.subr.bf16.mxu0 %v1232_v32 }
  0xbd   : > { %1107 = vmatpush3.bf16.msra.mxu1 %v1231_v33 }
  0xbf   : > { %642 = vmatpush1.bf16.msra.mxu0 %v1234_v34 }
 0x12d   : > { %v476_v6 = vpop.xlane.xlu0 %475 }
 0x12e   : > { %v480_v7 = vmul.f32 0.0078125, %v476_v6 }
 0x130   : > { %v1813_v8 = vsub.f32 %v471_v0, %v480_v7  ;;  %v540_v0 = vrot.slane %v535_v61, %v539_v60 }
 0x131   : > { %v478_v9 = vpop.xlane.xlu0 %477 }
 0x132   : > { %v481_v10 = vmul.f32 0.0078125, %v478_v9  ;;  %v484_v11 = vmul.f32 %v1813_v8, %v1813_v8 }
 0x134   : > { %v1817_v12 = vsub.f32 %v472_v1, %v481_v10  ;;  %486 = vadd.xlane.f32.xlu1 %v484_v11 }
 0x136   : > { %v485_v13 = vmul.f32 %v1817_v12, %v1817_v12 }
 0x138   : > { %488 = vadd.xlane.f32.xlu1 %v485_v13 }
 0x1c1   : > { %v487_v36 = vpop.xlane.xlu1 %486 }
 0x1c2   : > { %v490_v37 = vmul.f32 0.0078125, %v487_v36 }
 0x1c4   : > { %v492_v38 = vadd.f32 1e-05, %v490_v37 }
 0x1c5   : > { %v489_v39 = vpop.xlane.xlu1 %488 }
 0x1c6   : > { %1235 = vrsqrt.f32 %v492_v38  ;;  %v491_v40 = vmul.f32 0.0078125, %v489_v39 }
 0x1c8   : > { %v493_v41 = vadd.f32 1e-05, %v491_v40 }
 0x1ca   : > { %1237 = vrsqrt.f32 %v493_v41 }
 0x1d0   : > { %v1236_v42 = vpop.eup %1235 }
 0x1d1   : > { %v496_v44 = vmul.f32 %v1236_v42, %v1813_v8 }
 0x1d3   : > { %v504_v45 = vmul.f32 %v1040_v43, %v496_v44 }
 0x1d4   : > { %v1238_v46 = vpop.eup %1237 }
 0x1d5   : > { %v497_v48 = vmul.f32 %v1238_v46, %v1817_v12  ;;  %v512_v50 = vadd.f32 %v1041_v47, %v504_v45 }
 0x1d7   : > { %v505_v49 = vmul.f32 %v1040_v43, %v497_v48  ;;  %v516_v55 = vadd.f32 %v514_v51, %v512_v50 }
 0x1d9   : > { %v513_v53 = vadd.f32 %v1041_v47, %v505_v49 }
 0x1db   : > { %v670_v54 = vpack.c.bf16 %v513_v53, %v512_v50  ;;  %v517_v56 = vadd.f32 %v515_v52, %v513_v53 }
 0x1dd   : > { %1109 = vmatmul.mubr.bf16.vlgmr.msra.gmra.mrb[0].mxu1 %v670_v54  ;;  %v518_v57 = vpack.c.bf16 %v517_v56, %v516_v55 }
 0x1df   : > { %660 = vmatmul.mubr.bf16.vlgmr.msra.gmra.mrb[0].mxu0 %v518_v57 }
 0x2b0   : > { %v776_v1 = vpop.f32.mrb[0].mxu1 }
 0x2b1   : > { %v777_v3 = vadd.f32 %v1058_v63, %v776_v1  ;;  %v1110_v4 = vpop.f32.mrb[1].mxu1 }
 0x2b2   : > { %v661_v5 = vpop.f32.mrb[0].mxu0  ;;  %v779_v6 = vpop.f32.mrb[2].mxu1 }
 0x2b3   : > { %787 = vst [vmem:[%s464_s24] sm:$0xff] %v777_v3  ;;  %v662_v7 = vadd.f32 %v661_v5, %v540_v0  ;;  %v780_v8 = vadd.f32 %v1058_v63, %v779_v6  ;;  %v663_v9 = vpop.f32.mrb[1].mxu0  ;;  %v1111_v10 = vpop.f32.mrb[3].mxu1 }
 0x2b4   : > { %v664_v11 = vadd.f32 %v663_v9, %v544_v2  ;;  %v665_v12 = vpop.f32.mrb[2].mxu0 }
 0x2b5   : > { %783 = vst [vmem:[%s1840_s20] sm:$0xff] %v662_v7  ;;  %788 = vst [vmem:[%s464_s24 + $0x8] sm:$0xff] %v780_v8  ;;  %v666_v13 = vadd.f32 %v665_v12, %v540_v0  ;;  %v667_v14 = vpop.f32.mrb[3].mxu0  ;;  %s790_s24 = scalar_lea.sflag [#allocation4], %s1786_s27 }
 0x2b6   : > { %785 = vst [vmem:[%s1844_s0] sm:$0xff] %v664_v11  ;;  %v668_v15 = vadd.f32 %v667_v14, %v544_v2 }
 0x2b7   : > { %784 = vst [vmem:[%s1840_s20 + $0x8] sm:$0xff] %v666_v13 }
 0x2b8   : > { %786 = vst [vmem:[%s1844_s0 + $0x8] sm:$0xff] %v668_v15 }
 0x2b9   : > { %1368 = shalt.err (!%p1365_p5)
}
 0x2ba   : > { %s1369_s20 = scalar_lea.hbm %s1857_s18, 256  ;;  %s1373_s28 = scalar_lea.hbm %s1983_s8, 512 }
 0x2bb   : > { %p1370_p9 = scmp.ne.s32.totalorder %s1857_s18, %s1369_s20  ;;  %p1374_p11 = scmp.lt.u32.totalorder %s1857_s18, %s1983_s8 }
 0x2bc   : > { %p1375_p2 = scmp.lt.u32.totalorder %s1373_s28, %s1369_s20  ;;  %p1377_p1 = scmp.lt.u32.totalorder %s1369_s20, %s1857_s18 }
 0x2bd   : > { %p1371_p0 = pnand %p1370_p9, %p2022_p13 }
 0x2be   : > { %p1376_p12 = por %p1375_p2, %p1374_p11 }
 0x2bf   : > { %p1372_p8 = pneg %p1371_p0 }
 0x2c0   : > { %p1378_p6 = por %p1377_p1, %p1376_p12 }
 0x2c2   : > { %p1379_p10 = pnand %p1378_p6, %p1372_p8 }
 0x2c4   : > { %1382 = shalt.err (!%p1379_p10)
}
 0x2c5   : > { %s1507_s23 = smov 128   ;;  %s1508_s26 = smov 8  }
 0x2c6   : > { %1124 = dma.vmem_to_hbm [thread:$0]  (%p2022_p13), %s1849_s11, 256, %s1857_s18, %s790_s24, %s1507_s23, %s1507_s23, %s1508_s26  }
 0x2c7   : > { %s2023_s19 = sand.u32 1, %s1587_s17   ;;  %s1383_s20 = scalar_lea.vmem %s1851_s12, 256 }
 0x2c8   : > { %s1903_s29 = scalar_lea.sflag [#allocation12], %s2023_s19  ;;  %p1384_p4 = scmp.ne.s32.totalorder %s1851_s12, %s1383_s20 }
 0x2c9   : > { %s1509_s0 = smov [#allocation11]  }
 0x2ca   : > { %p1385_p7 = pnand %p1384_p4, %p2022_p13  ;;  %s1387_s13 = sshll.u32 %s1509_s0, 4  ;;  %s1388_s13 = int_to_ptr.vmem [resolvable:$false] %s1387_s13 }
 0x2cb   : > { %s1389_s28 = scalar_lea.vmem %s1388_s13, 512  ;;  %p1390_p5 = scmp.lt.s32.totalorder %s1851_s12, %s1388_s13 }
 0x2cc   : > { %p1386_p3 = pneg %p1385_p7  ;;  %p1391_p9 = scmp.lt.s32.totalorder %s1389_s28, %s1383_s20 }
 0x2ce   : > { %p1392_p0 = por %p1391_p9, %p1390_p5 }
 0x2d0   : > { %p1393_p8 = pnand %p1392_p0, %p1386_p3 }
 0x2d2   : > { %1396 = shalt.err (!%p1393_p8)
}
 0x2d3   : > { %s1397_s17 = scalar_lea.hbm %s1863_s15, 256  ;;  %s1401_s18 = scalar_lea.hbm %s1984_s9, 512 }
 0x2d4   : > { %p1398_p11 = scmp.ne.s32.totalorder %s1863_s15, %s1397_s17  ;;  %p1402_p1 = scmp.lt.u32.totalorder %s1863_s15, %s1984_s9 }
 0x2d5   : > { %p1403_p6 = scmp.lt.u32.totalorder %s1401_s18, %s1397_s17  ;;  %p1405_p4 = scmp.lt.u32.totalorder %s1397_s17, %s1863_s15 }
 0x2d6   : > { %p1399_p2 = pnand %p1398_p11, %p2022_p13 }
 0x2d7   : > { %p1404_p10 = por %p1403_p6, %p1402_p1 }
 0x2d8   : > { %p1400_p12 = pneg %p1399_p2 }
 0x2d9   : > { %p1406_p7 = por %p1405_p4, %p1404_p10 }
 0x2db   : > { %p1407_p3 = pnand %p1406_p7, %p1400_p12 }
 0x2dd   : > { %1410 = shalt.err (!%p1407_p3)
}
 0x2de   : > { %1125 = dma.vmem_to_hbm [thread:$0]  (%p2022_p13), %s1851_s12, 256, %s1863_s15, %s1903_s29, %s1507_s23, %s1507_s23, %s1508_s26  }
 0x2df   : > { %s1411_s4 = scalar_lea.vmem %s1865_s21, 256  ;;  %s1510_s19 = smov [#allocation13]  }
 0x2e0   : > { %p1412_p5 = scmp.ne.s32.totalorder %s1865_s21, %s1411_s4  ;;  %s1415_s20 = sshll.u32 %s1510_s19, 4  ;;  %s1416_s20 = int_to_ptr.vmem [resolvable:$false] %s1415_s20 }
 0x2e1   : > { %s1417_s0 = scalar_lea.vmem %s1416_s20, 512  ;;  %p1418_p8 = scmp.lt.s32.totalorder %s1865_s21, %s1416_s20 }
 0x2e2   : > { %p1413_p9 = pnand %p1412_p5, %p2022_p13  ;;  %p1419_p11 = scmp.lt.s32.totalorder %s1417_s0, %s1411_s4 }
 0x2e4   : > { %p1414_p0 = pneg %p1413_p9  ;;  %p1420_p2 = por %p1419_p11, %p1418_p8 }
 0x2e6   : > { %p1421_p12 = pnand %p1420_p2, %p1414_p0 }
 0x2e8   : > { %1424 = shalt.err (!%p1421_p12)
}
 0x2e9   : > { %s1425_s12 = scalar_lea.hbm %s1871_s6, 256  ;;  %s1429_s28 = scalar_lea.hbm %s1985_s10, 512 }
 0x2ea   : > { %p1426_p1 = scmp.ne.s32.totalorder %s1871_s6, %s1425_s12  ;;  %p1430_p4 = scmp.lt.u32.totalorder %s1871_s6, %s1985_s10 }
 0x2eb   : > { %p1431_p7 = scmp.lt.u32.totalorder %s1429_s28, %s1425_s12  ;;  %p1433_p5 = scmp.lt.u32.totalorder %s1425_s12, %s1871_s6 }
 0x2ec   : > { %p1427_p6 = pnand %p1426_p1, %p2022_p13 }
 0x2ed   : > { %p1432_p3 = por %p1431_p7, %p1430_p4 }
 0x2ee   : > { %p1428_p10 = pneg %p1427_p6 }
 0x2ef   : > { %p1434_p9 = por %p1433_p5, %p1432_p3 }
 0x2f1   : > { %p1435_p0 = pnand %p1434_p9, %p1428_p10 }
 0x2f3   : > { %1438 = shalt.err (!%p1435_p0)
}
 0x2f4   : > { %1126 = dma.vmem_to_hbm [thread:$0]  (%p2022_p13), %s1865_s21, 256, %s1871_s6, %s1903_s29, %s1507_s23, %s1507_s23, %s1508_s26  }
 0x2f5 PF: > { %s2024_s11 = sld [smem:[#allocation20_spill]]  ;;  %s2025_s18 = sld [smem:[#allocation22_spill]] }
 0x2f6   : > { %p2027_p11 = scmp.ge.s32.totalorder %s1493_s16, 2 }
 0x2fb   : > { %s860_s24 = sand.u32 1, %s2024_s11   ;;  %p2026_p8 = scmp.ne.s32.totalorder %s2025_s18, 0 }
 0x2fc   : > { %s861_s22 = scalar_lea.sflag [#allocation4], %s860_s24 }
 0x2fd   : > { %p1145_p2 = pnand %p2027_p11, %p2026_p8 }
 0x2ff   : > { %1472 = dma.done.wait (!%p1145_p2), %s861_s22, 256  }
 0x300   : > { %1474 = vsyncadd (!%p1145_p2), %s861_s22, 4294967040  ;;  %s2028_s25 = sadd.s32 4294967294, %s1493_s16  }
 0x301   : > { %s869_s4 = sand.u32 1, %s2028_s25  }
 0x302   : > { %s870_s19 = scalar_lea.sflag [#allocation12], %s869_s4 }
 0x303   : > { %1476 = dma.done.wait (!%p1145_p2), %s870_s19, 512  }
 0x304   : > { %1478 = vsyncadd (!%p1145_p2), %s870_s19, 4294966784  ;;  %s2029_s21 = sld [smem:[#allocation21_spill]]  ;;  %s2030_s15 = sld [smem:[#allocation23_spill]] }
 0x305   : > { %p31_p13 = scmp.ge.s32.totalorder %s1681_s30, 4   ;;  %s2031_s13 = smov %s1485_s14 }
 0x306   : > { %s2033_s16 = smov %s1681_s30 }
 0x307   :  { %33 = sbr.rel (!%p31_p13) target bundleno = 14 (0xe), region = 150 }
 0x30a   : > { %s2032_s14 = smov %s2029_s21 }
 0x30e   :  { %884 = vsyncpa [#allocation3], 1 }
 0x30f   :  { %886 = vsyncpa [#allocation3 + $0x1], 1 }
 0x310   :  { %887 = vsyncpa [#allocation6], 1 }
 0x311   :  { %889 = vsyncpa [#allocation6 + $0x1], 1 }
 0x312   :  { %890 = vsyncpa [#allocation9], 1 }
 0x313   :  { %891 = vsyncpa [#allocation4], 1 }
 0x314   :  { %893 = vsyncpa [#allocation4 + $0x1], 1 }
 0x315   :  { %894 = vsyncpa [#allocation12], 1 }
 0x316   :  { %896 = vsyncpa [#allocation12 + $0x1], 1 }

</bundles_post_ra>
